<compile_context>
chip_gen: v7x
topology: tpu7x:2x2x1
jax: 0.10.0
libtpu: 0.0.40
codegen_flags: <defaults>
</compile_context>

<pallas_src>
import jax
import jax.numpy as jnp
from jax.experimental import pallas as pl
from jax.experimental.pallas import tpu as pltpu


def _round_up(x, m):
    return ((x + m - 1) // m) * m


def _round_down(x, m):
    return (x // m) * m


def _tpu_hw_info():
    """(vmem_bytes_per_core, mxu_m_tile, num_tensorcores) with safe fallbacks."""
    vmem_bytes, mxu_m, num_tc = 64 * 1024 * 1024, 256, 1  # conservative default
    try:
        kind = jax.devices()[0].device_kind.lower()
    except Exception:
        kind = ""
    if "v5" in kind:
        vmem_bytes, mxu_m, num_tc = 128 << 20, 128, 1
    elif "v6" in kind:
        vmem_bytes, mxu_m, num_tc = 128 << 20, 256, 1
    elif "v7" in kind:
        vmem_bytes, mxu_m, num_tc = 64 << 20, 256, 2
    try:  # prefer the real number when the API exposes it
        info = pltpu.get_tpu_info()
        vmem_bytes = int(getattr(info, "vmem_capacity_bytes", vmem_bytes))
    except Exception:
        pass
    return vmem_bytes, mxu_m, num_tc


def _make_mlp_kernel(n_hchunks, h_chunk):
    """Kernel: o = relu(x @ w1 + b1) @ w2 + b2, optionally H-chunked."""

    def kernel(x_ref, w1_ref, b1_ref, w2_ref, b2_ref, o_ref):
        x = x_ref[...].astype(w1_ref.dtype)
        if n_hchunks == 1:
            # Single pass: (tb,F)@(F,H) -> bias+ReLU (f32) -> (tb,H)@(H,O).
            h = jnp.dot(x, w1_ref[...], preferred_element_type=jnp.float32)
            h = jnp.maximum(h + b1_ref[...], 0.0)
            y = jnp.dot(h.astype(w2_ref.dtype), w2_ref[...],
                        preferred_element_type=jnp.float32)
        else:
            # H-chunked accumulate: exact (ReLU is elementwise); shrinks the
            # live hidden state from (tb, H) to (tb, h_chunk).
            y = jnp.zeros((x.shape[0], o_ref.shape[-1]), jnp.float32)
            for c in range(n_hchunks):  # static unroll; chunk count is small
                lo = c * h_chunk
                hi = lo + h_chunk
                hc = jnp.dot(x, w1_ref[:, lo:hi],
                             preferred_element_type=jnp.float32)
                hc = jnp.maximum(hc + b1_ref[:, lo:hi], 0.0)
                y = y + jnp.dot(hc.astype(w2_ref.dtype), w2_ref[lo:hi, :],
                                preferred_element_type=jnp.float32)
        o_ref[...] = (y + b2_ref[...]).astype(o_ref.dtype)

    return kernel


def mlp_forward(x, w1, b1, w2, b2, *, tile_b=1024, use_bf16=True, h_chunk=None):
    """x: (B, F); w1: (F, H); b1: (H,); w2: (H, O); b2: (O,).  Returns (B, O)."""
    B, F = x.shape
    H = w1.shape[1]
    O = w2.shape[1]

    mm_dtype = jnp.bfloat16 if use_bf16 else x.dtype

    # ---- pad H / O to lane-dense (multiple-of-128) widths --------------------
    # Zero-padding is exact: relu(0 + 0) = 0 and padded W2 rows are zero;
    # padded output columns are sliced off below.
    # TODO(synk): in production, pre-pad the weights once outside the forward.
    Hp = _round_up(H, 128)
    Op = _round_up(O, 128)
    w1p = w1.astype(mm_dtype)
    w2p = w2.astype(mm_dtype)
    b1p = b1.astype(jnp.float32)
    b2p = b2.astype(jnp.float32)
    if Hp != H:
        w1p = jnp.pad(w1p, ((0, 0), (0, Hp - H)))
        b1p = jnp.pad(b1p, ((0, Hp - H),))
        w2p = jnp.pad(w2p, ((0, Hp - H), (0, 0)))
    if Op != O:
        w2p = jnp.pad(w2p, ((0, 0), (0, Op - O)))
        b2p = jnp.pad(b2p, ((0, Op - O),))
    b1_2d = b1p.reshape(1, Hp)
    b2_2d = b2p.reshape(1, Op)
    # TODO(synk): F is left unpadded (padding it needs a per-call copy of x);
    # pad F to a multiple of 128 upstream if it is not already.

    # ---- hidden-dim chunking --------------------------------------------------
    if h_chunk is None:
        h_chunk = Hp if Hp <= 2048 else 512
    h_chunk = min(int(h_chunk), Hp)
    if Hp % h_chunk != 0 or h_chunk % 128 != 0:
        h_chunk = Hp  # fall back to single-pass
    n_hchunks = Hp // h_chunk

    # ---- hardware-aware VMEM budget & batch tile selection --------------------
    vmem_bytes, mxu_m, num_tc = _tpu_hw_info()
    budget = int(vmem_bytes * 0.80)  # ~20% headroom under physical VMEM

    itm_x = jnp.dtype(x.dtype).itemsize
    itm_w = jnp.dtype(mm_dtype).itemsize
    # Resident (single-buffered) weights + biases.
    weight_bytes = (F * Hp + Hp * Op) * itm_w + (Hp + Op) * 4
    # Live bytes per batch row: double-buffered x tile, double-buffered out
    # tile, hidden chunk in f32 + its mm-dtype copy, f32 y accumulator.
    per_row = (2 * F * itm_x + 2 * Op * itm_x
               + h_chunk * (4 + itm_w) + Op * 4)

    avail = budget - weight_bytes
    if avail <= per_row * 8:
        # TODO(synk): weights too large for the fully-resident path; stream
        # W1/W2 over an H-tiled grid axis with a VMEM accumulator instead.
        tb_max = mxu_m
    else:
        tb_max = avail // per_row

    cap = max(8, min(int(tile_b), int(tb_max)))
    if B <= cap:
        if num_tc > 1 and B >= 2 * mxu_m:
            # Two tiles so the "parallel" batch axis spreads across both
            # TensorCores (v7x); each half stays >= one MXU M tile.
            tb = _round_up(pl.cdiv(B, 2), mxu_m)
        else:
            tb = B  # block == full dim: always legal, no masking at all
    else:
        tb = _round_down(cap, mxu_m) or _round_down(cap, 8) or 8
    grid = (pl.cdiv(B, tb),)  # ragged last block is masked by Pallas

    # ---- cost estimate ---------------------------------------------------------
    cost = pl.CostEstimate(
        flops=2 * B * (F * Hp + Hp * Op),
        transcendentals=0,
        bytes_accessed=int(B * F * itm_x + B * Op * itm_x + weight_bytes),
    )

    kernel = _make_mlp_kernel(n_hchunks, h_chunk)

    def build_and_run(single_buffer_weights):
        wb_mult = 1 if single_buffer_weights else 2
        needed = wb_mult * weight_bytes + tb * per_row
        vmem_limit = int(min(budget, max(needed * 1.2, 32 * 1024 * 1024)))
        res_kw = ({"pipeline_mode": pl.Buffered(1)}
                  if single_buffer_weights else {})
        in_specs = [
            pl.BlockSpec((tb, F), lambda i: (i, 0)),              # x tile (streamed)
            pl.BlockSpec((F, Hp), lambda i: (0, 0), **res_kw),    # w1 (resident)
            pl.BlockSpec((1, Hp), lambda i: (0, 0), **res_kw),    # b1
            pl.BlockSpec((Hp, Op), lambda i: (0, 0), **res_kw),   # w2 (resident)
            pl.BlockSpec((1, Op), lambda i: (0, 0), **res_kw),    # b2
        ]
        call = pl.pallas_call(
            kernel,
            out_shape=jax.ShapeDtypeStruct((B, Op), x.dtype),
            grid_spec=pltpu.PrefetchScalarGridSpec(
                num_scalar_prefetch=0,
                grid=grid,
                in_specs=in_specs,
                out_specs=pl.BlockSpec((tb, Op), lambda i: (i, 0)),
            ),
            compiler_params=pltpu.CompilerParams(
                dimension_semantics=("parallel",),
                vmem_limit_bytes=vmem_limit,
            ),
            cost_estimate=cost,
        )
        return call(x, w1p, b1_2d, w2p, b2_2d)

    try:
        out = build_and_run(True)
    except Exception:
        # pl.Buffered(1) residency not supported on this jax build -> fall back
        # to the (previously validated) default double-buffered resident specs.
        out = build_and_run(False)

    if Op != O:
        out = out[:, :O]
    return out


def init_params(key, n_feature, n_hidden, n_output, dtype=jnp.float32):
    """Deterministic init mimicking nn.Linear's uniform(-1/sqrt(fan_in), ...)."""
    k1, k2, k3, k4 = jax.random.split(key, 4)
    lim1 = 1.0 / jnp.sqrt(n_feature)
    lim2 = 1.0 / jnp.sqrt(n_hidden)
    # Stored pre-transposed: (in, out)
    w1 = jax.random.uniform(k1, (n_feature, n_hidden), dtype, -lim1, lim1)
    b1 = jax.random.uniform(k2, (n_hidden,), dtype, -lim1, lim1)
    w2 = jax.random.uniform(k3, (n_hidden, n_output), dtype, -lim2, lim2)
    b2 = jax.random.uniform(k4, (n_output,), dtype, -lim2, lim2)
    return w1, b1, w2, b2


def _reference(x, w1, b1, w2, b2, use_bf16=True):
    """Plain-JAX reference following the same precision path as the kernel."""
    mm = jnp.bfloat16 if use_bf16 else x.dtype
    h = jnp.dot(x.astype(mm), w1.astype(mm), preferred_element_type=jnp.float32)
    h = jnp.maximum(h + b1.astype(jnp.float32), 0.0)
    y = jnp.dot(h.astype(mm), w2.astype(mm), preferred_element_type=jnp.float32)
    return (y + b2.astype(jnp.float32)).astype(x.dtype)


if __name__ == "__main__":
    key = jax.random.PRNGKey(0)
    kx, kp, kx2, kp2, kx3 = jax.random.split(key, 5)

    # 1) Small shape implied by the module: Linear(32->64) -> ReLU -> Linear(64->16).
    n_feature, n_hidden, n_output = 32, 64, 16
    batch = 8
    x = jax.random.normal(kx, (batch, n_feature), jnp.float32)
    w1, b1, w2, b2 = init_params(kp, n_feature, n_hidden, n_output)
    y = jax.block_until_ready(mlp_forward(x, w1, b1, w2, b2))
    ref = _reference(x, w1, b1, w2, b2)
    assert y.shape == (batch, n_output)
    assert jnp.allclose(y, ref, atol=1e-2, rtol=1e-2), \
        float(jnp.max(jnp.abs(y - ref)))

    # 2) Ragged multi-tile batch (masked last block, >= 2 grid steps).
    x2 = jax.random.normal(kx2, (100, n_feature), jnp.float32)
    y2 = jax.block_until_ready(mlp_forward(x2, w1, b1, w2, b2, tile_b=64))
    ref2 = _reference(x2, w1, b1, w2, b2)
    assert y2.shape == (100, n_output)
    assert jnp.allclose(y2, ref2, atol=1e-2, rtol=1e-2), \
        float(jnp.max(jnp.abs(y2 - ref2)))

    # 3) Larger, 128-aligned config exercising the H-chunked accumulate path.
    F3, H3, O3, B3 = 256, 1024, 256, 512
    x3 = jax.random.normal(kx3, (B3, F3), jnp.float32)
    w13, b13, w23, b23 = init_params(kp2, F3, H3, O3)
    y3 = jax.block_until_ready(mlp_forward(x3, w13, b13, w23, b23, h_chunk=256))
    ref3 = _reference(x3, w13, b13, w23, b23)
    assert y3.shape == (B3, O3)
    assert jnp.allclose(y3, ref3, atol=2e-2, rtol=2e-2), \
        float(jnp.max(jnp.abs(y3 - ref3)))

    print("KERNEL_OK")
</pallas_src>

<mosaic_0001>
module attributes {stable_mosaic.version = 11 : i64} {
  func.func @kernel(%arg0: i32, %arg1: memref<8x32xf32, #tpu.memory_space<vmem>>, %arg2: memref<32x128xbf16, #tpu.memory_space<vmem>>, %arg3: memref<1x128xf32, #tpu.memory_space<vmem>>, %arg4: memref<128x128xbf16, #tpu.memory_space<vmem>>, %arg5: memref<1x128xf32, #tpu.memory_space<vmem>>, %arg6: memref<8x128xf32, #tpu.memory_space<vmem>>) attributes {dimension_semantics = [#tpu.dimension_semantics<parallel>], iteration_bounds = array<i64: 1>, scalar_prefetch = 0 : i64, scratch_operands = 0 : i64, tpu.core_type = #tpu.core_type<tc>, window_params = [{transform_indices = @transform_0, window_bounds = array<i64: 8, 32>}, {pipeline_mode = #tpu.pipeline_mode<synchronous>, transform_indices = @transform_1, window_bounds = array<i64: 32, 128>}, {pipeline_mode = #tpu.pipeline_mode<synchronous>, transform_indices = @transform_2, window_bounds = array<i64: 1, 128>}, {pipeline_mode = #tpu.pipeline_mode<synchronous>, transform_indices = @transform_3, window_bounds = array<i64: 128, 128>}, {pipeline_mode = #tpu.pipeline_mode<synchronous>, transform_indices = @transform_4, window_bounds = array<i64: 1, 128>}, {transform_indices = @transform_5, window_bounds = array<i64: 8, 128>}]} {
    %c0 = arith.constant 0 : index
    %c0_0 = arith.constant 0 : index
    %0 = vector.load %arg1[%c0, %c0_0] : memref<8x32xf32, #tpu.memory_space<vmem>>, vector<8x32xf32>
    %1 = arith.truncf %0 : vector<8x32xf32> to vector<8x32xbf16>
    %c0_1 = arith.constant 0 : index
    %c0_2 = arith.constant 0 : index
    %2 = vector.load %arg2[%c0_1, %c0_2] : memref<32x128xbf16, #tpu.memory_space<vmem>>, vector<32x128xbf16>
    %cst = arith.constant dense<0.000000e+00> : vector<8x128xf32>
    %3 = tpu.matmul %1, %2, %cst {dimension_numbers = #tpu.dot_dimension_numbers<[1], [0], [0], [1], [0, 0, 1, 1], [], []>} : vector<8x32xbf16>, vector<32x128xbf16>, vector<8x128xf32> -> vector<8x128xf32>
    %c0_3 = arith.constant 0 : index
    %c0_4 = arith.constant 0 : index
    %4 = vector.load %arg3[%c0_3, %c0_4] : memref<1x128xf32, #tpu.memory_space<vmem>>, vector<1x128xf32>
    %5 = vector.broadcast %4 : vector<1x128xf32> to vector<8x128xf32>
    %6 = arith.addf %3, %5 : vector<8x128xf32>
    %cst_5 = arith.constant 0.000000e+00 : f32
    %7 = vector.broadcast %cst_5 : f32 to vector<8x128xf32>
    %8 = arith.maximumf %6, %7 : vector<8x128xf32>
    %9 = arith.truncf %8 : vector<8x128xf32> to vector<8x128xbf16>
    %c0_6 = arith.constant 0 : index
    %c0_7 = arith.constant 0 : index
    %10 = vector.load %arg4[%c0_6, %c0_7] : memref<128x128xbf16, #tpu.memory_space<vmem>>, vector<128x128xbf16>
    %cst_8 = arith.constant dense<0.000000e+00> : vector<8x128xf32>
    %11 = tpu.matmul %9, %10, %cst_8 {dimension_numbers = #tpu.dot_dimension_numbers<[1], [0], [0], [1], [0, 0, 1, 1], [], []>} : vector<8x128xbf16>, vector<128x128xbf16>, vector<8x128xf32> -> vector<8x128xf32>
    %c0_9 = arith.constant 0 : index
    %c0_10 = arith.constant 0 : index
    %12 = vector.load %arg5[%c0_9, %c0_10] : memref<1x128xf32, #tpu.memory_space<vmem>>, vector<1x128xf32>
    %13 = vector.broadcast %12 : vector<1x128xf32> to vector<8x128xf32>
    %14 = arith.addf %11, %13 : vector<8x128xf32>
    %c0_11 = arith.constant 0 : index
    %c0_12 = arith.constant 0 : index
    %15 = vector.load %arg6[%c0_11, %c0_12] : memref<8x128xf32, #tpu.memory_space<vmem>>, vector<8x128xf32>
    tpu.vector_store %arg6[%c0_11, %c0_12], %14 {strides = array<i32>} : memref<8x128xf32, #tpu.memory_space<vmem>>, vector<8x128xf32>,
    return
  }
  func.func @transform_0(%arg0: i32) -> (i32, i32) {
    %c0_i32 = arith.constant 0 : i32
    %c0_i32_0 = arith.constant 0 : i32
    return %arg0, %c0_i32 : i32, i32
  }
  func.func @transform_1(%arg0: i32) -> (i32, i32) {
    %c0_i32 = arith.constant 0 : i32
    %c0_i32_0 = arith.constant 0 : i32
    %c0_i32_1 = arith.constant 0 : i32
    return %c0_i32, %c0_i32_0 : i32, i32
  }
  func.func @transform_2(%arg0: i32) -> (i32, i32) {
    %c0_i32 = arith.constant 0 : i32
    %c0_i32_0 = arith.constant 0 : i32
    %c0_i32_1 = arith.constant 0 : i32
    return %c0_i32, %c0_i32_0 : i32, i32
  }
  func.func @transform_3(%arg0: i32) -> (i32, i32) {
    %c0_i32 = arith.constant 0 : i32
    %c0_i32_0 = arith.constant 0 : i32
    %c0_i32_1 = arith.constant 0 : i32
    return %c0_i32, %c0_i32_0 : i32, i32
  }
  func.func @transform_4(%arg0: i32) -> (i32, i32) {
    %c0_i32 = arith.constant 0 : i32
    %c0_i32_0 = arith.constant 0 : i32
    %c0_i32_1 = arith.constant 0 : i32
    return %c0_i32, %c0_i32_0 : i32, i32
  }
  func.func @transform_5(%arg0: i32) -> (i32, i32) {
    %c0_i32 = arith.constant 0 : i32
    %c0_i32_0 = arith.constant 0 : i32
    return %arg0, %c0_i32 : i32, i32
  }
}

module attributes {stable_mosaic.version = 11 : i64} {
  func.func @kernel(%arg0: i32, %arg1: memref<8x32xf32, #tpu.memory_space<vmem>>, %arg2: memref<32x128xbf16, #tpu.memory_space<vmem>>, %arg3: memref<1x128xf32, #tpu.memory_space<vmem>>, %arg4: memref<128x128xbf16, #tpu.memory_space<vmem>>, %arg5: memref<1x128xf32, #tpu.memory_space<vmem>>, %arg6: memref<8x128xf32, #tpu.memory_space<vmem>>) attributes {dimension_semantics = [#tpu.dimension_semantics<parallel>], iteration_bounds = array<i64: 1>, scalar_prefetch = 0 : i64, scratch_operands = 0 : i64, tpu.core_type = #tpu.core_type<tc>, window_params = [{transform_indices = @transform_0, window_bounds = array<i64: 8, 32>}, {pipeline_mode = #tpu.pipeline_mode<synchronous>, transform_indices = @transform_1, window_bounds = array<i64: 32, 128>}, {pipeline_mode = #tpu.pipeline_mode<synchronous>, transform_indices = @transform_2, window_bounds = array<i64: 1, 128>}, {pipeline_mode = #tpu.pipeline_mode<synchronous>, transform_indices = @transform_3, window_bounds = array<i64: 128, 128>}, {pipeline_mode = #tpu.pipeline_mode<synchronous>, transform_indices = @transform_4, window_bounds = array<i64: 1, 128>}, {transform_indices = @transform_5, window_bounds = array<i64: 8, 128>}]} {
    %c0 = arith.constant 0 : index
    %c0_0 = arith.constant 0 : index
    %0 = vector.load %arg1[%c0, %c0_0] : memref<8x32xf32, #tpu.memory_space<vmem>>, vector<8x32xf32>
    %1 = arith.truncf %0 : vector<8x32xf32> to vector<8x32xbf16>
    %c0_1 = arith.constant 0 : index
    %c0_2 = arith.constant 0 : index
    %2 = vector.load %arg2[%c0_1, %c0_2] : memref<32x128xbf16, #tpu.memory_space<vmem>>, vector<32x128xbf16>
    %cst = arith.constant dense<0.000000e+00> : vector<8x128xf32>
    %3 = tpu.matmul %1, %2, %cst {dimension_numbers = #tpu.dot_dimension_numbers<[1], [0], [0], [1], [0, 0, 1, 1], [], []>} : vector<8x32xbf16>, vector<32x128xbf16>, vector<8x128xf32> -> vector<8x128xf32>
    %c0_3 = arith.constant 0 : index
    %c0_4 = arith.constant 0 : index
    %4 = vector.load %arg3[%c0_3, %c0_4] : memref<1x128xf32, #tpu.memory_space<vmem>>, vector<1x128xf32>
    %5 = vector.broadcast %4 : vector<1x128xf32> to vector<8x128xf32>
    %6 = arith.addf %3, %5 : vector<8x128xf32>
    %cst_5 = arith.constant 0.000000e+00 : f32
    %7 = vector.broadcast %cst_5 : f32 to vector<8x128xf32>
    %8 = arith.maximumf %6, %7 : vector<8x128xf32>
    %9 = arith.truncf %8 : vector<8x128xf32> to vector<8x128xbf16>
    %c0_6 = arith.constant 0 : index
    %c0_7 = arith.constant 0 : index
    %10 = vector.load %arg4[%c0_6, %c0_7] : memref<128x128xbf16, #tpu.memory_space<vmem>>, vector<128x128xbf16>
    %cst_8 = arith.constant dense<0.000000e+00> : vector<8x128xf32>
    %11 = tpu.matmul %9, %10, %cst_8 {dimension_numbers = #tpu.dot_dimension_numbers<[1], [0], [0], [1], [0, 0, 1, 1], [], []>} : vector<8x128xbf16>, vector<128x128xbf16>, vector<8x128xf32> -> vector<8x128xf32>
    %c0_9 = arith.constant 0 : index
    %c0_10 = arith.constant 0 : index
    %12 = vector.load %arg5[%c0_9, %c0_10] : memref<1x128xf32, #tpu.memory_space<vmem>>, vector<1x128xf32>
    %13 = vector.broadcast %12 : vector<1x128xf32> to vector<8x128xf32>
    %14 = arith.addf %11, %13 : vector<8x128xf32>
    %c0_11 = arith.constant 0 : index
    %c0_12 = arith.constant 0 : index
    %15 = vector.load %arg6[%c0_11, %c0_12] : memref<8x128xf32, #tpu.memory_space<vmem>>, vector<8x128xf32>
    tpu.vector_store %arg6[%c0_11, %c0_12], %14 {strides = array<i32>} : memref<8x128xf32, #tpu.memory_space<vmem>>, vector<8x128xf32>,
    return
  }
  func.func @transform_0(%arg0: i32) -> (i32, i32) {
    %c0_i32 = arith.constant 0 : i32
    %c0_i32_0 = arith.constant 0 : i32
    return %arg0, %c0_i32 : i32, i32
  }
  func.func @transform_1(%arg0: i32) -> (i32, i32) {
    %c0_i32 = arith.constant 0 : i32
    %c0_i32_0 = arith.constant 0 : i32
    %c0_i32_1 = arith.constant 0 : i32
    return %c0_i32, %c0_i32_0 : i32, i32
  }
  func.func @transform_2(%arg0: i32) -> (i32, i32) {
    %c0_i32 = arith.constant 0 : i32
    %c0_i32_0 = arith.constant 0 : i32
    %c0_i32_1 = arith.constant 0 : i32
    return %c0_i32, %c0_i32_0 : i32, i32
  }
  func.func @transform_3(%arg0: i32) -> (i32, i32) {
    %c0_i32 = arith.constant 0 : i32
    %c0_i32_0 = arith.constant 0 : i32
    %c0_i32_1 = arith.constant 0 : i32
    return %c0_i32, %c0_i32_0 : i32, i32
  }
  func.func @transform_4(%arg0: i32) -> (i32, i32) {
    %c0_i32 = arith.constant 0 : i32
    %c0_i32_0 = arith.constant 0 : i32
    %c0_i32_1 = arith.constant 0 : i32
    return %c0_i32, %c0_i32_0 : i32, i32
  }
  func.func @transform_5(%arg0: i32) -> (i32, i32) {
    %c0_i32 = arith.constant 0 : i32
    %c0_i32_0 = arith.constant 0 : i32
    return %arg0, %c0_i32 : i32, i32
  }
}

</mosaic_0001>

<bundles_post_ra>
// kernel: tpu_custom_call.1
= control target key start
LH: loop header
LB: loop body
LE: loop exit
PB: predicated region body
PF: predicated region fallthrough
CT: control target
= control target key end

     0   :  { %10 = vsyncpa [#allocation3], 0  ;;  %s523_s0 = inlined_call_operand.hbm [shape: f32[8,32], index: 0, kind: input, shape index: {}]   ;;  %s524_s1 = inlined_call_operand.hbm [shape: bf16[32,128], index: 1, kind: input, shape index: {}]   ;;  %s525_s2 = inlined_call_operand.vmem [shape: f32[1,128], index: 2, kind: input, shape index: {}]   ;;  %s526_s3 = inlined_call_operand.hbm [shape: bf16[128,128], index: 3, kind: input, shape index: {}]   ;;  %s527_s4 = inlined_call_operand.vmem [shape: f32[1,128], index: 4, kind: input, shape index: {}]   ;;  %s528_s5 = inlined_call_operand.hbm [shape: f32[8,128], index: 5, kind: output, shape index: {}]  }
   0x1   :  { %11 = vsyncpa [#allocation6], 0 }
   0x2   :  { %12 = vsyncpa [#allocation4], 0  ;;  %s425_s18 = smov [#allocation5]   ;;  %s331_s22 = scalar_lea.hbm %s524_s1, 256 }
   0x3   :  { %s28_s19 = sshll.u32 %s425_s18, 4  ;;  %p332_p0 = scmp.ne.s32.totalorder %s524_s1, %s331_s22  ;;  %s29_s19 = int_to_ptr.vmem [resolvable:$true] %s28_s19 }
   0x4   :  { %p335_p1 = scmp.lt.u32.totalorder %s331_s22, %s524_s1 }
   0x6   :  { %p337_p2 = pnand %p335_p1, %p332_p0 }
   0x8   :  { %340 = shalt.err (!%p337_p2)
}
   0x9   :  { %s341_s27 = scalar_lea.vmem %s29_s19, 256  ;;  %p346_p4 = scmp.lt.s32.totalorder %s29_s19, %s29_s19 }
   0xa   :  { %p342_p3 = scmp.ne.s32.totalorder %s29_s19, %s341_s27  ;;  %p347_p5 = scmp.lt.s32.totalorder %s341_s27, %s341_s27 }
   0xc   :  { %p348_p6 = por %p347_p5, %p346_p4 }
   0xe   :  { %p349_p7 = pnand %p348_p6, %p342_p3 }
  0x10   :  { %352 = shalt.err (!%p349_p7)
}
  0x11   :  { %s426_s28 = smov 64   ;;  %s427_s29 = smov 4  }
  0x12   :  { %34 = dma.hbm_to_vmem [thread:$0]  %s524_s1, 256, %s29_s19, [#allocation6], %s426_s28, %s426_s28, %s427_s29  }
  0x13   :  { %s428_s7 = smov [#allocation2]   ;;  %s429_s9 = smov [#allocation7]  }
  0x14   :  { %s19_s8 = sshll.u32 %s428_s7, 4  ;;  %s42_s10 = sshll.u32 %s429_s9, 4  ;;  %s20_s8 = int_to_ptr.vmem [resolvable:$true] %s19_s8  ;;  %s43_s10 = int_to_ptr.vmem [resolvable:$true] %s42_s10 }
  0x15   :  { %s353_s13 = scalar_lea.hbm %s523_s0, 128 }
  0x16   :  { %p354_p8 = scmp.ne.s32.totalorder %s523_s0, %s353_s13  ;;  %p357_p9 = scmp.lt.u32.totalorder %s353_s13, %s523_s0 }
  0x18   :  { %p359_p10 = pnand %p357_p9, %p354_p8 }
  0x1a   :  { %362 = shalt.err (!%p359_p10)
}
  0x1b   :  { %s363_s1 = scalar_lea.vmem %s20_s8, 128  ;;  %p368_p12 = scmp.lt.s32.totalorder %s20_s8, %s20_s8 }
  0x1c   :  { %p364_p11 = scmp.ne.s32.totalorder %s20_s8, %s363_s1  ;;  %p369_p13 = scmp.lt.s32.totalorder %s363_s1, %s363_s1 }
  0x1e   :  { %p370_p0 = por %p369_p13, %p368_p12 }
  0x20   :  { %p371_p1 = pnand %p370_p0, %p364_p11 }
  0x22   :  { %374 = shalt.err (!%p371_p1)
}
  0x23   :  { %22 = dma.hbm_to_vmem [thread:$0]  %s523_s0, 128, %s20_s8, [#allocation3]  }
  0x24   :  { %s375_s22 = scalar_lea.hbm %s526_s3, 1024 }
  0x25   :  { %p376_p2 = scmp.ne.s32.totalorder %s526_s3, %s375_s22  ;;  %p379_p3 = scmp.lt.u32.totalorder %s375_s22, %s526_s3 }
  0x27   :  { %p381_p4 = pnand %p379_p3, %p376_p2 }
  0x29   :  { %384 = shalt.err (!%p381_p4)
}
  0x2a   :  { %s385_s27 = scalar_lea.vmem %s43_s10, 1024  ;;  %p390_p6 = scmp.lt.s32.totalorder %s43_s10, %s43_s10 }
  0x2b   :  { %p386_p5 = scmp.ne.s32.totalorder %s43_s10, %s385_s27  ;;  %p391_p7 = scmp.lt.s32.totalorder %s385_s27, %s385_s27 }
  0x2d   :  { %p392_p8 = por %p391_p7, %p390_p6 }
  0x2f   :  { %p393_p9 = pnand %p392_p8, %p386_p5 }
  0x31   :  { %396 = shalt.err (!%p393_p9)
}
  0x32   :  { %48 = dma.hbm_to_vmem [thread:$0]  %s526_s3, 1024, %s43_s10, [#allocation6], %s426_s28, %s426_s28, %s427_s29  }
  0x33   :  { %419 = dma.done.wait [#allocation3], 128  }
  0x34   :  { %420 = vsyncadd [#allocation3], 4294967168 }
  0x35   :  { %421 = dma.done.wait [#allocation6], 1280  }
  0x36   :  { %422 = vsyncadd [#allocation6], 4294966016  ;;  %v430_v0 = vmov 0.0   ;;  %vm431_vm0 = vmmov 0   ;;  %v321_v1 = vld [vmem:[#allocation5] sm:$0xff]   ;;  %v322_v2 = vld [vmem:[#allocation5 + $0x8] sm:$0xff]  }
  0x37   :  { %285 = vmatprep.subr.bf16.mxu0 %v430_v0  ;;  %289 = vmatprep.mubr.msk.bf16.mxu0 %vm431_vm0, %v430_v0  ;;  %v61_v3 = vld [vmem:[#allocation2] sm:$0xff]  ;;  %v323_v4 = vld [vmem:[#allocation7] sm:$0xff]   ;;  %vm86_vm1 = vcmask 261120   ;;  %v325_v7 = vld [vmem:[#allocation7 + $0x10] sm:$0xff]   ;;  %s432_s7 = smov [#allocation8]  }
  0x38   :  { %293 = vmatprep.subr.bf16.mxu1 %v430_v0  ;;  %309 = vmatprep.mubr.msk.bf16.mxu1 %vm431_vm0, %v430_v0  ;;  %v62_v5 = vpack.c.bf16 %v61_v3, %v61_v3  ;;  %v324_v6 = vld [vmem:[#allocation7 + $0x8] sm:$0xff]   ;;  %v326_v8 = vld [vmem:[#allocation7 + $0x18] sm:$0xff]   ;;  %v327_v9 = vld [vmem:[#allocation7 + $0x20] sm:$0xff]   ;;  %s250_s8 = sshll.u32 %s432_s7, 4  ;;  %s251_s8 = int_to_ptr.vmem [resolvable:$true] %s250_s8 }
  0x39   :  { %286 = vmatpush3.bf16.msra.mxu0 %v321_v1  ;;  %294 = vmatpush3.bf16.msra.mxu1 %v323_v4  ;;  %v328_v10 = vld [vmem:[#allocation7 + $0x28] sm:$0xff]   ;;  %v329_v11 = vld [vmem:[#allocation7 + $0x30] sm:$0xff]   ;;  %v330_v12 = vld [vmem:[#allocation7 + $0x38] sm:$0xff]   ;;  %p402_p11 = scmp.lt.s32.totalorder %s251_s8, %s251_s8 }
  0x3a   :  { %287 = vmatprep.subr.bf16.mxu0 %v430_v0  ;;  %295 = vmatprep.subr.bf16.mxu1 %v430_v0  ;;  %v260_v13 = vld [vmem:[%s525_s2] ss:$0 sm:$0xff]  ;;  %s397_s2 = scalar_lea.vmem %s251_s8, 128 }
  0x3b   :  { %v264_v21 = vld [vmem:[%s527_s4] ss:$0 sm:$0xff]  ;;  %p398_p10 = scmp.ne.s32.totalorder %s251_s8, %s397_s2  ;;  %p403_p12 = scmp.lt.s32.totalorder %s397_s2, %s397_s2 }
  0x3d   :  { %288 = vmatpush3.bf16.msra.mxu0 %v322_v2  ;;  %296 = vmatpush3.bf16.msra.mxu1 %v324_v6  ;;  %p404_p13 = por %p403_p12, %p402_p11 }
  0x3e   :  { %297 = vmatprep.subr.bf16.mxu1 %v430_v0 }
  0x3f   :  { %p405_p0 = pnand %p404_p13, %p398_p10 }
  0x40   :  { %290 = vmatmul.mubr.msk.bf16.vlgmr.msra.gmra.mrb[0].mxu0 %vm86_vm1, %v62_v5 }
  0x41   :  { %298 = vmatpush3.bf16.msra.mxu1 %v325_v7 }
  0x42   :  { %299 = vmatprep.subr.bf16.mxu1 %v430_v0 }
  0x45   :  { %300 = vmatpush3.bf16.msra.mxu1 %v326_v8 }
  0x46   :  { %301 = vmatprep.subr.bf16.mxu1 %v430_v0 }
  0x49   :  { %302 = vmatpush3.bf16.msra.mxu1 %v327_v9 }
  0x4a   :  { %303 = vmatprep.subr.bf16.mxu1 %v430_v0 }
  0x4d   :  { %304 = vmatpush3.bf16.msra.mxu1 %v328_v10 }
  0x4e   :  { %305 = vmatprep.subr.bf16.mxu1 %v430_v0 }
  0x51   :  { %306 = vmatpush3.bf16.msra.mxu1 %v329_v11 }
  0x52   :  { %307 = vmatprep.subr.bf16.mxu1 %v430_v0 }
  0x55   :  { %308 = vmatpush3.bf16.msra.mxu1 %v330_v12 }
 0x113   :  { %v124_v14 = vpop.f32.mrb[0].mxu0 }
 0x114   :  { %v125_v15 = vadd.f32 %v260_v13, %v124_v14  ;;  %v291_v16 = vpop.f32.mrb[1].mxu0 }
 0x115   :  { %v127_v17 = vpop.f32.mrb[2].mxu0 }
 0x116   :  { %v130_v18 = vmax.f32 %v125_v15, 0.0  ;;  %v292_v19 = vpop.f32.mrb[3].mxu0 }
 0x118   :  { %v131_v20 = vpack.c.bf16 %v130_v18, %v130_v18 }
 0x11a   :  { %310 = vmatmul.mubr.bf16.vlgmr.msra.gmra.mrb[0].mxu1 %v131_v20 }
 0x1ed   :  { %v237_v22 = vpop.f32.mrb[0].mxu1 }
 0x1ee   :  { %v238_v23 = vadd.f32 %v264_v21, %v237_v22  ;;  %v311_v24 = vpop.f32.mrb[1].mxu1 }
 0x1ef   :  { %v240_v25 = vpop.f32.mrb[2].mxu1 }
 0x1f0   :  { %243 = vst [vmem:[#allocation8] sm:$0xff] %v238_v23  ;;  %v312_v26 = vpop.f32.mrb[3].mxu1 }
 0x1f1   :  { %408 = shalt.err (!%p405_p0)
}
 0x1f2   :  { %s409_s4 = scalar_lea.hbm %s528_s5, 128 }
 0x1f3   :  { %p410_p1 = scmp.ne.s32.totalorder %s528_s5, %s409_s4  ;;  %p413_p2 = scmp.lt.u32.totalorder %s409_s4, %s528_s5 }
 0x1f5   :  { %p415_p3 = pnand %p413_p2, %p410_p1 }
 0x1f7   :  { %418 = shalt.err (!%p415_p3)
}
 0x1f8   :  { %253 = dma.vmem_to_hbm [thread:$0]  %s251_s8, 128, %s528_s5, [#allocation4]  }
 0x1f9   :  { %423 = dma.done.wait [#allocation4], 128  }
 0x1fa   :  { %424 = vsyncadd [#allocation4], 4294967168 }
 0x1fb   :  { %257 = vsyncpa [#allocation3], 1 }
 0x1fc   :  { %258 = vsyncpa [#allocation6], 1 }
 0x1fd   :  { %259 = vsyncpa [#allocation4], 1 }

// kernel: tpu_custom_call.1
= control target key start
LH: loop header
LB: loop body
LE: loop exit
PB: predicated region body
PF: predicated region fallthrough
CT: control target
= control target key end

     0   :  { %10 = vsyncpa [#allocation3], 0  ;;  %s523_s0 = inlined_call_operand.hbm [shape: f32[8,32], index: 0, kind: input, shape index: {}]   ;;  %s524_s1 = inlined_call_operand.hbm [shape: bf16[32,128], index: 1, kind: input, shape index: {}]   ;;  %s525_s2 = inlined_call_operand.vmem [shape: f32[1,128], index: 2, kind: input, shape index: {}]   ;;  %s526_s3 = inlined_call_operand.hbm [shape: bf16[128,128], index: 3, kind: input, shape index: {}]   ;;  %s527_s4 = inlined_call_operand.vmem [shape: f32[1,128], index: 4, kind: input, shape index: {}]   ;;  %s528_s5 = inlined_call_operand.hbm [shape: f32[8,128], index: 5, kind: output, shape index: {}]  }
   0x1   :  { %11 = vsyncpa [#allocation6], 0 }
   0x2   :  { %12 = vsyncpa [#allocation4], 0  ;;  %s425_s18 = smov [#allocation5]   ;;  %s331_s22 = scalar_lea.hbm %s524_s1, 256 }
   0x3   :  { %s28_s19 = sshll.u32 %s425_s18, 4  ;;  %p332_p0 = scmp.ne.s32.totalorder %s524_s1, %s331_s22  ;;  %s29_s19 = int_to_ptr.vmem [resolvable:$true] %s28_s19 }
   0x4   :  { %p335_p1 = scmp.lt.u32.totalorder %s331_s22, %s524_s1 }
   0x6   :  { %p337_p2 = pnand %p335_p1, %p332_p0 }
   0x8   :  { %340 = shalt.err (!%p337_p2)
}
   0x9   :  { %s341_s27 = scalar_lea.vmem %s29_s19, 256  ;;  %p346_p4 = scmp.lt.s32.totalorder %s29_s19, %s29_s19 }
   0xa   :  { %p342_p3 = scmp.ne.s32.totalorder %s29_s19, %s341_s27  ;;  %p347_p5 = scmp.lt.s32.totalorder %s341_s27, %s341_s27 }
   0xc   :  { %p348_p6 = por %p347_p5, %p346_p4 }
   0xe   :  { %p349_p7 = pnand %p348_p6, %p342_p3 }
  0x10   :  { %352 = shalt.err (!%p349_p7)
}
  0x11   :  { %s426_s28 = smov 64   ;;  %s427_s29 = smov 4  }
  0x12   :  { %34 = dma.hbm_to_vmem [thread:$0]  %s524_s1, 256, %s29_s19, [#allocation6], %s426_s28, %s426_s28, %s427_s29  }
  0x13   :  { %s428_s7 = smov [#allocation2]   ;;  %s429_s9 = smov [#allocation7]  }
  0x14   :  { %s19_s8 = sshll.u32 %s428_s7, 4  ;;  %s42_s10 = sshll.u32 %s429_s9, 4  ;;  %s20_s8 = int_to_ptr.vmem [resolvable:$true] %s19_s8  ;;  %s43_s10 = int_to_ptr.vmem [resolvable:$true] %s42_s10 }
  0x15   :  { %s353_s13 = scalar_lea.hbm %s523_s0, 128 }
  0x16   :  { %p354_p8 = scmp.ne.s32.totalorder %s523_s0, %s353_s13  ;;  %p357_p9 = scmp.lt.u32.totalorder %s353_s13, %s523_s0 }
  0x18   :  { %p359_p10 = pnand %p357_p9, %p354_p8 }
  0x1a   :  { %362 = shalt.err (!%p359_p10)
}
  0x1b   :  { %s363_s1 = scalar_lea.vmem %s20_s8, 128  ;;  %p368_p12 = scmp.lt.s32.totalorder %s20_s8, %s20_s8 }
  0x1c   :  { %p364_p11 = scmp.ne.s32.totalorder %s20_s8, %s363_s1  ;;  %p369_p13 = scmp.lt.s32.totalorder %s363_s1, %s363_s1 }
  0x1e   :  { %p370_p0 = por %p369_p13, %p368_p12 }
  0x20   :  { %p371_p1 = pnand %p370_p0, %p364_p11 }
  0x22   :  { %374 = shalt.err (!%p371_p1)
}
  0x23   :  { %22 = dma.hbm_to_vmem [thread:$0]  %s523_s0, 128, %s20_s8, [#allocation3]  }
  0x24   :  { %s375_s22 = scalar_lea.hbm %s526_s3, 1024 }
  0x25   :  { %p376_p2 = scmp.ne.s32.totalorder %s526_s3, %s375_s22  ;;  %p379_p3 = scmp.lt.u32.totalorder %s375_s22, %s526_s3 }
  0x27   :  { %p381_p4 = pnand %p379_p3, %p376_p2 }
  0x29   :  { %384 = shalt.err (!%p381_p4)
}
  0x2a   :  { %s385_s27 = scalar_lea.vmem %s43_s10, 1024  ;;  %p390_p6 = scmp.lt.s32.totalorder %s43_s10, %s43_s10 }
  0x2b   :  { %p386_p5 = scmp.ne.s32.totalorder %s43_s10, %s385_s27  ;;  %p391_p7 = scmp.lt.s32.totalorder %s385_s27, %s385_s27 }
  0x2d   :  { %p392_p8 = por %p391_p7, %p390_p6 }
  0x2f   :  { %p393_p9 = pnand %p392_p8, %p386_p5 }
  0x31   :  { %396 = shalt.err (!%p393_p9)
}
  0x32   :  { %48 = dma.hbm_to_vmem [thread:$0]  %s526_s3, 1024, %s43_s10, [#allocation6], %s426_s28, %s426_s28, %s427_s29  }
  0x33   :  { %419 = dma.done.wait [#allocation3], 128  }
  0x34   :  { %420 = vsyncadd [#allocation3], 4294967168 }
  0x35   :  { %421 = dma.done.wait [#allocation6], 1280  }
  0x36   :  { %422 = vsyncadd [#allocation6], 4294966016  ;;  %v430_v0 = vmov 0.0   ;;  %vm431_vm0 = vmmov 0   ;;  %v321_v1 = vld [vmem:[#allocation5] sm:$0xff]   ;;  %v322_v2 = vld [vmem:[#allocation5 + $0x8] sm:$0xff]  }
  0x37   :  { %285 = vmatprep.subr.bf16.mxu0 %v430_v0  ;;  %289 = vmatprep.mubr.msk.bf16.mxu0 %vm431_vm0, %v430_v0  ;;  %v61_v3 = vld [vmem:[#allocation2] sm:$0xff]  ;;  %v323_v4 = vld [vmem:[#allocation7] sm:$0xff]   ;;  %vm86_vm1 = vcmask 261120   ;;  %v325_v7 = vld [vmem:[#allocation7 + $0x10] sm:$0xff]   ;;  %s432_s7 = smov [#allocation8]  }
  0x38   :  { %293 = vmatprep.subr.bf16.mxu1 %v430_v0  ;;  %309 = vmatprep.mubr.msk.bf16.mxu1 %vm431_vm0, %v430_v0  ;;  %v62_v5 = vpack.c.bf16 %v61_v3, %v61_v3  ;;  %v324_v6 = vld [vmem:[#allocation7 + $0x8] sm:$0xff]   ;;  %v326_v8 = vld [vmem:[#allocation7 + $0x18] sm:$0xff]   ;;  %v327_v9 = vld [vmem:[#allocation7 + $0x20] sm:$0xff]   ;;  %s250_s8 = sshll.u32 %s432_s7, 4  ;;  %s251_s8 = int_to_ptr.vmem [resolvable:$true] %s250_s8 }
  0x39   :  { %286 = vmatpush3.bf16.msra.mxu0 %v321_v1  ;;  %294 = vmatpush3.bf16.msra.mxu1 %v323_v4  ;;  %v328_v10 = vld [vmem:[#allocation7 + $0x28] sm:$0xff]   ;;  %v329_v11 = vld [vmem:[#allocation7 + $0x30] sm:$0xff]   ;;  %v330_v12 = vld [vmem:[#allocation7 + $0x38] sm:$0xff]   ;;  %p402_p11 = scmp.lt.s32.totalorder %s251_s8, %s251_s8 }
  0x3a   :  { %287 = vmatprep.subr.bf16.mxu0 %v430_v0  ;;  %295 = vmatprep.subr.bf16.mxu1 %v430_v0  ;;  %v260_v13 = vld [vmem:[%s525_s2] ss:$0 sm:$0xff]  ;;  %s397_s2 = scalar_lea.vmem %s251_s8, 128 }
  0x3b   :  { %v264_v21 = vld [vmem:[%s527_s4] ss:$0 sm:$0xff]  ;;  %p398_p10 = scmp.ne.s32.totalorder %s251_s8, %s397_s2  ;;  %p403_p12 = scmp.lt.s32.totalorder %s397_s2, %s397_s2 }
  0x3d   :  { %288 = vmatpush3.bf16.msra.mxu0 %v322_v2  ;;  %296 = vmatpush3.bf16.msra.mxu1 %v324_v6  ;;  %p404_p13 = por %p403_p12, %p402_p11 }
  0x3e   :  { %297 = vmatprep.subr.bf16.mxu1 %v430_v0 }
  0x3f   :  { %p405_p0 = pnand %p404_p13, %p398_p10 }
  0x40   :  { %290 = vmatmul.mubr.msk.bf16.vlgmr.msra.gmra.mrb[0].mxu0 %vm86_vm1, %v62_v5 }
  0x41   :  { %298 = vmatpush3.bf16.msra.mxu1 %v325_v7 }
  0x42   :  { %299 = vmatprep.subr.bf16.mxu1 %v430_v0 }
  0x45   :  { %300 = vmatpush3.bf16.msra.mxu1 %v326_v8 }
  0x46   :  { %301 = vmatprep.subr.bf16.mxu1 %v430_v0 }
  0x49   :  { %302 = vmatpush3.bf16.msra.mxu1 %v327_v9 }
  0x4a   :  { %303 = vmatprep.subr.bf16.mxu1 %v430_v0 }
  0x4d   :  { %304 = vmatpush3.bf16.msra.mxu1 %v328_v10 }
  0x4e   :  { %305 = vmatprep.subr.bf16.mxu1 %v430_v0 }
  0x51   :  { %306 = vmatpush3.bf16.msra.mxu1 %v329_v11 }
  0x52   :  { %307 = vmatprep.subr.bf16.mxu1 %v430_v0 }
  0x55   :  { %308 = vmatpush3.bf16.msra.mxu1 %v330_v12 }
 0x113   :  { %v124_v14 = vpop.f32.mrb[0].mxu0 }
 0x114   :  { %v125_v15 = vadd.f32 %v260_v13, %v124_v14  ;;  %v291_v16 = vpop.f32.mrb[1].mxu0 }
 0x115   :  { %v127_v17 = vpop.f32.mrb[2].mxu0 }
 0x116   :  { %v130_v18 = vmax.f32 %v125_v15, 0.0  ;;  %v292_v19 = vpop.f32.mrb[3].mxu0 }
 0x118   :  { %v131_v20 = vpack.c.bf16 %v130_v18, %v130_v18 }
 0x11a   :  { %310 = vmatmul.mubr.bf16.vlgmr.msra.gmra.mrb[0].mxu1 %v131_v20 }
 0x1ed   :  { %v237_v22 = vpop.f32.mrb[0].mxu1 }
 0x1ee   :  { %v238_v23 = vadd.f32 %v264_v21, %v237_v22  ;;  %v311_v24 = vpop.f32.mrb[1].mxu1 }
 0x1ef   :  { %v240_v25 = vpop.f32.mrb[2].mxu1 }
 0x1f0   :  { %243 = vst [vmem:[#allocation8] sm:$0xff] %v238_v23  ;;  %v312_v26 = vpop.f32.mrb[3].mxu1 }
 0x1f1   :  { %408 = shalt.err (!%p405_p0)
}
 0x1f2   :  { %s409_s4 = scalar_lea.hbm %s528_s5, 128 }
 0x1f3   :  { %p410_p1 = scmp.ne.s32.totalorder %s528_s5, %s409_s4  ;;  %p413_p2 = scmp.lt.u32.totalorder %s409_s4, %s528_s5 }
 0x1f5   :  { %p415_p3 = pnand %p413_p2, %p410_p1 }
 0x1f7   :  { %418 = shalt.err (!%p415_p3)
}
 0x1f8   :  { %253 = dma.vmem_to_hbm [thread:$0]  %s251_s8, 128, %s528_s5, [#allocation4]  }
 0x1f9   :  { %423 = dma.done.wait [#allocation4], 128  }
 0x1fa   :  { %424 = vsyncadd [#allocation4], 4294967168 }
 0x1fb   :  { %257 = vsyncpa [#allocation3], 1 }
 0x1fc   :  { %258 = vsyncpa [#allocation6], 1 }
 0x1fd   :  { %259 = vsyncpa [#allocation4], 1 }

</bundles_post_ra>
